<compile_context>
chip_gen: v7x
topology: tpu7x:2x2x1
jax: 0.10.0
libtpu: 0.0.40
codegen_flags: <defaults>
</compile_context>

<pallas_src>
import functools
from math import sqrt

import jax
import jax.numpy as jnp
from jax import lax
from jax.experimental import pallas as pl
from jax.experimental.pallas import tpu as pltpu


def _round_up(a, b):
    return ((a + b - 1) // b) * b


def _sublane(dtype):
    # Min sublane multiple for the second-minor dim: 8 (f32), 16 (bf16), 32 (i8/fp8).
    return max(8, 32 // jnp.dtype(dtype).itemsize)


def _pad2(a, rows, cols):
    pr, pc = rows - a.shape[0], cols - a.shape[1]
    if pr == 0 and pc == 0:
        return a                      # already aligned: no copy at all
    return jnp.pad(a, ((0, pr), (0, pc)))


def _vmem_capacity_bytes():
    try:
        return int(pltpu.get_tpu_info().vmem_capacity_bytes)
    except Exception:
        return 64 * 1024 * 1024       # conservative default (v7x per-core VMEM)


# x (tb, tk) contracted with w (tn, tk) along the LAST dim of both -> (tb, tn).
# The MXU handles the transposed-RHS contraction natively, so the wrapper never
# materializes weight.T.
_TRANS_B = (((1,), (1,)), ((), ()))


def _single_k_kernel(x_ref, w_ref, b_ref, o_ref, *, w_mul, b_mul):
    # Whole reduction in one step: no scratch accumulator, fused epilogue.
    acc = lax.dot_general(x_ref[...], w_ref[...], _TRANS_B,
                          preferred_element_type=jnp.float32)
    out = acc * w_mul + b_ref[...].astype(jnp.float32) * b_mul
    o_ref[...] = out.astype(o_ref.dtype)


def _multi_k_kernel(x_ref, w_ref, b_ref, o_ref, acc_ref, *, w_mul, b_mul):
    k = pl.program_id(2)

    @pl.when(k == 0)
    def _():
        acc_ref[...] = jnp.zeros_like(acc_ref)

    acc_ref[...] += lax.dot_general(x_ref[...], w_ref[...], _TRANS_B,
                                    preferred_element_type=jnp.float32)

    @pl.when(k == pl.num_programs(2) - 1)
    def _():
        # Equal-LR scale applied once to the (tb, tn) accumulator.
        out = acc_ref[...] * w_mul + b_ref[...].astype(jnp.float32) * b_mul
        o_ref[...] = out.astype(o_ref.dtype)


def _weight_spec(shape, index_map, buffer_count):
    # Deeper weight pipelining for long K loops (helps bandwidth-poor v5e).
    if buffer_count is None:
        return pl.BlockSpec(shape, index_map)
    try:
        return pl.BlockSpec(shape, index_map,
                            pipeline_mode=pl.Buffered(buffer_count))
    except Exception:                 # older jax without pipeline_mode/Buffered
        return pl.BlockSpec(shape, index_map)


def equal_linear(x, weight, bias=None, *, w_mul=None, b_mul=1.0,
                 block_b=512, block_n=512, block_k=1024):
    """EqualLinear forward: y = x @ (weight * w_mul).T + bias * b_mul.

    x: (..., in_dim); weight: (out_dim, in_dim) -- native PyTorch layout, NOT
    transposed; bias: (out_dim,) or None.  w_mul defaults to sqrt(2 / in_dim)
    (the equal_lr hook); pass w_mul/b_mul explicitly for the mapping_linear path.
    """
    out_dim, in_dim = weight.shape
    if w_mul is None:
        # equal_lr: fan_in = weight.size(1) * weight[0][0].numel() = in_dim
        w_mul = sqrt(2.0 / in_dim)
    if bias is None:
        bias = jnp.zeros((out_dim,), dtype=x.dtype)

    lead_shape = x.shape[:-1]
    B = 1
    for d in lead_shape:
        B *= d
    xb = x.reshape(B, in_dim)

    # ---- tile selection -----------------------------------------------------
    sub = _sublane(x.dtype)                       # dtype-aware sublane rounding
    lane_k = 256 if in_dim >= 256 else 128        # 256-aligned for v6e/v7x MXU
    lane_n = 256 if out_dim >= 256 else 128

    tb = min(_round_up(block_b, sub), _round_up(B, sub))
    tk = min(_round_up(block_k, lane_k), _round_up(in_dim, lane_k))
    tn = min(_round_up(block_n, lane_n), _round_up(out_dim, lane_n))

    Bp, Kp, Np = _round_up(B, tb), _round_up(in_dim, tk), _round_up(out_dim, tn)
    nb, nn, nk = Bp // tb, Np // tn, Kp // tk

    # Megacore coverage: give v7x's second TensorCore at least one block along
    # a parallel axis (negligible extra per-step cost on single-TC v5e/v6e).
    if nb == 1 and nn == 1:
        if Bp > sub:
            tb = _round_up((Bp + 1) // 2, sub)
            Bp = _round_up(B, tb)
            nb = Bp // tb
        elif tn >= 256:
            tn //= 2
            Np = _round_up(out_dim, tn)
            nn = Np // tn

    # ---- operand prep (no transpose; pads are no-ops when already aligned) --
    # TODO(synk): for a real training/inference loop, pre-pad the parameters
    # once at init time so even the remainder-shape pads leave the hot path.
    xb = _pad2(xb, Bp, Kp)
    wp = _pad2(weight, Np, Kp)                    # native (out, in) layout
    bp = _pad2(bias.reshape(1, out_dim), 1, Np)

    # ---- generation-aware VMEM budget ---------------------------------------
    x_item = jnp.dtype(x.dtype).itemsize
    w_item = jnp.dtype(weight.dtype).itemsize
    wbuf = 3 if nk >= 3 else None
    w_bufs = 3 if wbuf is not None else 2
    footprint = (2 * (tb * tk * x_item + tb * tn * x_item + tn * 4)
                 + w_bufs * tn * tk * w_item)
    if nk > 1:
        footprint += tb * tn * 4                  # f32 accumulator scratch
    cap = _vmem_capacity_bytes()
    vmem_limit = int(min(cap * 3 // 4, max(32 << 20, footprint + (8 << 20))))

    out_shape = jax.ShapeDtypeStruct((Bp, Np), x.dtype)

    if nk == 1:
        # Single-K fast path.  Batch axis innermost: the (tn, Kp) weight panel
        # keeps the same block index across consecutive steps, so Pallas skips
        # the re-DMA and the weight is streamed once per n-tile.
        kernel = functools.partial(_single_k_kernel, w_mul=w_mul, b_mul=b_mul)
        out = pl.pallas_call(
            kernel,
            out_shape=out_shape,
            grid_spec=pltpu.PrefetchScalarGridSpec(
                num_scalar_prefetch=0,
                grid=(nn, nb),
                in_specs=[
                    pl.BlockSpec((tb, tk), lambda j, i: (i, 0)),
                    pl.BlockSpec((tn, tk), lambda j, i: (j, 0)),
                    pl.BlockSpec((1, tn), lambda j, i: (0, j)),
                ],
                out_specs=pl.BlockSpec((tb, tn), lambda j, i: (i, j)),
            ),
            compiler_params=pltpu.CompilerParams(
                dimension_semantics=("parallel", "parallel"),
                vmem_limit_bytes=vmem_limit,
            ),
        )(xb, wp, bp)
    else:
        # General path: canonical (i, j, k) tiled reduction, f32 accumulator.
        kernel = functools.partial(_multi_k_kernel, w_mul=w_mul, b_mul=b_mul)
        out = pl.pallas_call(
            kernel,
            out_shape=out_shape,
            grid_spec=pltpu.PrefetchScalarGridSpec(
                num_scalar_prefetch=0,
                grid=(nb, nn, nk),
                in_specs=[
                    pl.BlockSpec((tb, tk), lambda i, j, k: (i, k)),
                    _weight_spec((tn, tk), lambda i, j, k: (j, k), wbuf),
                    pl.BlockSpec((1, tn), lambda i, j, k: (0, j)),
                ],
                out_specs=pl.BlockSpec((tb, tn), lambda i, j, k: (i, j)),
                scratch_shapes=[pltpu.VMEM((tb, tn), jnp.float32)],
            ),
            compiler_params=pltpu.CompilerParams(
                dimension_semantics=("parallel", "parallel", "arbitrary"),
                vmem_limit_bytes=vmem_limit,
            ),
        )(xb, wp, bp)

    return out[:B, :out_dim].reshape(lead_shape + (out_dim,))


def _reference(x, weight, bias, w_mul, b_mul=1.0):
    return x @ (weight * w_mul).T + bias * b_mul


if __name__ == "__main__":
    key = jax.random.PRNGKey(0)
    k1, k2, k3, k4 = jax.random.split(key, 4)

    # --- main demo: batch=2, seq=8, in_dim=32, out_dim=32 (equal_lr path) ----
    # Integer-valued f32 inputs + power-of-two scale (sqrt(2/32)=0.25) keep the
    # kernel and the XLA reference bit-exact regardless of MXU precision mode.
    in_dim, out_dim = 32, 32
    x = jax.random.randint(k1, (2, 8, in_dim), -4, 5).astype(jnp.float32)
    weight = jax.random.randint(k2, (out_dim, in_dim), -4, 5).astype(jnp.float32)
    bias = jnp.zeros((out_dim,), jnp.float32)       # linear.bias.data.zero_()

    out = equal_linear(x, weight, bias)
    out = jax.block_until_ready(out)

    ref = _reference(x, weight, bias, sqrt(2.0 / in_dim))
    assert out.shape == (2, 8, out_dim)
    assert jnp.allclose(out, ref, atol=1e-6, rtol=1e-6), "mismatch vs reference"

    # --- sanity check exercising the multi-K accumulator path ----------------
    in2, out2 = 512, 256                            # sqrt(2/512) = 1/16, exact
    x2 = jax.random.randint(k3, (16, in2), -3, 4).astype(jnp.float32)
    w2 = jax.random.randint(k4, (out2, in2), -3, 4).astype(jnp.float32)
    b2 = jnp.zeros((out2,), jnp.float32)

    out2_v = equal_linear(x2, w2, b2, block_b=8, block_n=128, block_k=128)
    out2_v = jax.block_until_ready(out2_v)
    ref2 = _reference(x2, w2, b2, sqrt(2.0 / in2))
    assert jnp.allclose(out2_v, ref2, atol=1e-6, rtol=1e-6), "tiled-grid mismatch"

    # --- mapping_linear path: explicit (w_mul, b_mul) -------------------------
    out3 = equal_linear(x2, w2, b2, w_mul=0.5, b_mul=2.0)
    out3 = jax.block_until_ready(out3)
    ref3 = _reference(x2, w2, b2, 0.5, 2.0)
    assert jnp.allclose(out3, ref3, atol=1e-6, rtol=1e-6), "mapping-path mismatch"

    print("KERNEL_OK")
</pallas_src>

<mosaic_0001>
module attributes {stable_mosaic.version = 11 : i64} {
  func.func @_single_k_kernel(%arg0: i32, %arg1: i32, %arg2: memref<8x128xf32, #tpu.memory_space<vmem>>, %arg3: memref<128x128xf32, #tpu.memory_space<vmem>>, %arg4: memref<1x128xf32, #tpu.memory_space<vmem>>, %arg5: memref<8x128xf32, #tpu.memory_space<vmem>>) attributes {dimension_semantics = [#tpu.dimension_semantics<parallel>, #tpu.dimension_semantics<parallel>], iteration_bounds = array<i64: 1, 2>, scalar_prefetch = 0 : i64, scratch_operands = 0 : i64, tpu.core_type = #tpu.core_type<tc>, window_params = [{transform_indices = @transform_0, window_bounds = array<i64: 8, 128>}, {transform_indices = @transform_1, window_bounds = array<i64: 128, 128>}, {transform_indices = @transform_2, window_bounds = array<i64: 1, 128>}, {transform_indices = @transform_3, window_bounds = array<i64: 8, 128>}]} {
    %c0 = arith.constant 0 : index
    %c0_0 = arith.constant 0 : index
    %0 = vector.load %arg2[%c0, %c0_0] : memref<8x128xf32, #tpu.memory_space<vmem>>, vector<8x128xf32>
    %c0_1 = arith.constant 0 : index
    %c0_2 = arith.constant 0 : index
    %1 = vector.load %arg3[%c0_1, %c0_2] : memref<128x128xf32, #tpu.memory_space<vmem>>, vector<128x128xf32>
    %cst = arith.constant dense<0.000000e+00> : vector<8x128xf32>
    %2 = tpu.matmul %0, %1, %cst {dimension_numbers = #tpu.dot_dimension_numbers<[1], [1], [0], [0], [0, 0, 1, 0], [], []>} : vector<8x128xf32>, vector<128x128xf32>, vector<8x128xf32> -> vector<8x128xf32>
    %cst_3 = arith.constant 2.500000e-01 : f32
    %3 = vector.broadcast %cst_3 : f32 to vector<8x128xf32>
    %4 = arith.mulf %2, %3 : vector<8x128xf32>
    %c0_4 = arith.constant 0 : index
    %c0_5 = arith.constant 0 : index
    %5 = vector.load %arg4[%c0_4, %c0_5] : memref<1x128xf32, #tpu.memory_space<vmem>>, vector<1x128xf32>
    %cst_6 = arith.constant 1.000000e+00 : f32
    %6 = vector.broadcast %cst_6 : f32 to vector<1x128xf32>
    %7 = arith.mulf %5, %6 : vector<1x128xf32>
    %8 = vector.broadcast %7 : vector<1x128xf32> to vector<8x128xf32>
    %9 = arith.addf %4, %8 : vector<8x128xf32>
    %c0_7 = arith.constant 0 : index
    %c0_8 = arith.constant 0 : index
    %10 = vector.load %arg5[%c0_7, %c0_8] : memref<8x128xf32, #tpu.memory_space<vmem>>, vector<8x128xf32>
    tpu.vector_store %arg5[%c0_7, %c0_8], %9 {strides = array<i32>} : memref<8x128xf32, #tpu.memory_space<vmem>>, vector<8x128xf32>,
    return
  }
  func.func @transform_0(%arg0: i32, %arg1: i32) -> (i32, i32) {
    %c0_i32 = arith.constant 0 : i32
    %c0_i32_0 = arith.constant 0 : i32
    return %arg1, %c0_i32 : i32, i32
  }
  func.func @transform_1(%arg0: i32, %arg1: i32) -> (i32, i32) {
    %c0_i32 = arith.constant 0 : i32
    %c0_i32_0 = arith.constant 0 : i32
    return %arg0, %c0_i32 : i32, i32
  }
  func.func @transform_2(%arg0: i32, %arg1: i32) -> (i32, i32) {
    %c0_i32 = arith.constant 0 : i32
    %c0_i32_0 = arith.constant 0 : i32
    return %c0_i32, %arg0 : i32, i32
  }
  func.func @transform_3(%arg0: i32, %arg1: i32) -> (i32, i32) {
    %c0_i32 = arith.constant 0 : i32
    return %arg1, %arg0 : i32, i32
  }
}

</mosaic_0001>

<bundles_post_ra>
// kernel: tpu_custom_call.1
= control target key start
LH: loop header
LB: loop body
LE: loop exit
PB: predicated region body
PF: predicated region fallthrough
CT: control target
= control target key end

     0   :  { %8 = vsyncpa [#allocation3], 0  ;;  %s1022_s0 = inlined_call_operand.hbm [shape: f32[16,128], index: 0, kind: input, shape index: {}]   ;;  %s1023_s1 = inlined_call_operand.hbm [shape: f32[128,128], index: 1, kind: input, shape index: {}]   ;;  %s1024_s2 = inlined_call_operand.vmem [shape: f32[1,128], index: 2, kind: input, shape index: {}]   ;;  %s1025_s3 = inlined_call_operand.hbm [shape: f32[16,128], index: 3, kind: output, shape index: {}]  }
   0x1   :  { %10 = vsyncpa [#allocation3 + $0x1], 0 }
   0x2   :  { %11 = vsyncpa [#allocation6], 0 }
   0x3   :  { %12 = vsyncpa [#allocation4], 0 }
   0x4   :  { %14 = vsyncpa [#allocation4 + $0x1], 0  ;;  %s798_s12 = smov 0   ;;  %s800_s13 = smov 0  }
   0x5   :  { %s802_s14 = smov 0   ;;  %s804_s15 = smov 0  }
   0x6   :  { %s806_s16 = smov 0   ;;  %s808_s17 = smov 0  }
   0x7 LB: > { %s453_s18 = sadd.s32 4294967295, %s768_s17   ;;  %s454_s19 = sadd.s32 4294967294, %s768_s17   ;;  %s768_s17 = sphi %s808_s17, %s20_s17   ;;  %s764_s16 = sphi %s806_s16, %s1049_s16   ;;  %s760_s15 = sphi %s804_s15, %s1048_s15   ;;  %s756_s14 = sphi %s802_s14, %s1047_s14   ;;  %s752_s13 = sphi %s800_s13, %s1046_s13   ;;  %s748_s12 = sphi %s798_s12, %s1045_s12  }
   0x8   : > { %p52_p0 = scmp.ne.s32.totalorder %s752_s13, %s748_s12  ;;  %p832_p1 = scmp.eq.s32.totalorder %s453_s18, 0 }
   0x9   : > { %p836_p2 = scmp.eq.s32.totalorder %s453_s18, 1  ;;  %p136_p3 = scmp.eq.s32.totalorder %s454_s19, 1 }
   0xa   : > { %s1030_s20 = scalar_select %p832_p1, 1, 0 }
   0xb   : > { %s1031_s21 = scalar_select %p836_p2, 1, 0 }
   0xc   : > { %p842_p4 = por %p832_p1, %p52_p0  ;;  %p455_p5 = scmp.ge.s32.totalorder %s768_s17, 1 }
   0xd   : > { %p847_p6 = por %p136_p3, %p52_p0  ;;  %p143_p7 = scmp.lt.s32.totalorder %s768_s17, 3 }
   0xe   : > { %s1032_s22 = scalar_select %p842_p4, 1, 0 }
   0xf   : > { %s1033_s23 = scalar_select %p847_p6, 1, 0 }
  0x10   : > { %p852_p8 = pnand %p455_p5, %p143_p7  ;;  %s770_s25 = smov [#allocation5]  }
  0x11   : > { %s158_s26 = sshll.u32 %s770_s25, 4  ;;  %s29_s28 = sadd.s32 1, %s764_s16  ;;  %s159_s26 = int_to_ptr.vmem [resolvable:$true] %s158_s26 }
  0x12   : > { %s1034_s24 = scalar_select %p852_p8, 1, 0 }
  0x13   : > { %p554_p9 = pneg %p852_p8  ;;  %s624_s4 = scalar_lea.hbm %s1023_s1, 2048 }
  0x14   : > { %p625_p12 = scmp.ne.s32.totalorder %s1023_s1, %s624_s4  ;;  %p631_p5 = scmp.lt.u32.totalorder %s624_s4, %s1023_s1 }
  0x15   : > { %p861_p11 = pnand %p554_p9, %p832_p1 }
  0x17   : > { %p626_p13 = pneg %p861_p11 }
  0x19   : > { %p627_p0 = pnand %p626_p13, %p625_p12 }
  0x1b   : > { %p628_p3 = pneg %p627_p0 }
  0x1d   : > { %p633_p7 = pnand %p631_p5, %p628_p3 }
  0x1f   : > { %636 = shalt.err (!%p633_p7)
}
  0x20   : > { %s637_s9 = scalar_lea.vmem %s159_s26, 2048  ;;  %p645_p1 = scmp.lt.s32.totalorder %s159_s26, %s159_s26 }
  0x21   : > { %p638_p9 = scmp.ne.s32.totalorder %s159_s26, %s637_s9  ;;  %p646_p4 = scmp.lt.s32.totalorder %s637_s9, %s637_s9 }
  0x23   : > { %p640_p10 = pnand %p638_p9, %p626_p13  ;;  %p647_p8 = por %p646_p4, %p645_p1 }
  0x25   : > { %p641_p6 = pneg %p640_p10 }
  0x27   : > { %p648_p2 = pnand %p647_p8, %p641_p6 }
  0x29   : > { %651 = shalt.err (!%p648_p2)
}
  0x2a   : > { %s771_s10 = smov 128   ;;  %s772_s11 = smov 8  }
  0x2b   : > { %557 = dma.hbm_to_vmem [thread:$0]  (!%p861_p11), %s1023_s1, 2048, %s159_s26, [#allocation6], %s771_s10, %s771_s10, %s772_s11  }
  0x2c   : > { %p30_p1 = scmp.ge.s32.totalorder %s29_s28, 2  ;;  %s39_s25 = sadd.s32 1, %s756_s14 }
  0x2d   : > { %p46_p2 = scmp.ne.s32.totalorder %s756_s14, %s752_s13  ;;  %p47_p4 = scmp.eq.s32.totalorder %s768_s17, 0 }
  0x2e   : > { %s1051_s28 = smov (%p30_p1, %s29_s28), 0  ;;  %p1037_p8 = scmp.ne.s32.totalorder %s1031_s21, 0 }
  0x2f   : > { %p888_p6 = por %p47_p4, %p46_p2  ;;  %s36_s27 = ssub.s32 %s764_s16, %s1051_s28 }
  0x30   : > { %p894_p10 = por %p1037_p8, %p46_p2  ;;  %p567_p12 = scmp.lt.s32.totalorder %s768_s17, 2 }
  0x31   : > { %p37_p11 = scmp.eq.s32.totalorder %s36_s27, 0  ;;  %s178_s26 = sand.u32 1, %s756_s14  }
  0x32   : > { %s459_s4 = sshll.u32 %s178_s26, 3  ;;  %s460_s6 = sshll.u32 %s764_s16, 7 }
  0x33   : > { %s903_s5 = scalar_select %p37_p11, %s756_s14, %s39_s25  }
  0x34   : > { %s909_s9 = scalar_lea.hbm %s1022_s0, %s460_s6  ;;  %s182_s21 = scalar_lea.vmem [#allocation2], %s459_s4 }
  0x35   : > { %s189_s10 = sshll.u32 %s182_s21, 4  ;;  %p915_p13 = pnand %p567_p12, %p888_p6  ;;  %s911_s10 = int_to_ptr.vmem [resolvable:$true] %s189_s10 }
  0x36   : > { %s179_s18 = scalar_lea.sflag [#allocation3], %s178_s26  ;;  %s652_s19 = scalar_lea.hbm %s909_s9, 128 }
  0x37   : > { %p653_p0 = scmp.ne.s32.totalorder %s909_s9, %s652_s19  ;;  %p654_p3 = pneg %p915_p13 }
  0x38   : > { %s657_s4 = scalar_lea.hbm %s1022_s0, 256  ;;  %p658_p9 = scmp.lt.u32.totalorder %s909_s9, %s1022_s0 }
  0x39   : > { %p655_p5 = pnand %p654_p3, %p653_p0  ;;  %p659_p1 = scmp.lt.u32.totalorder %s657_s4, %s652_s19 }
  0x3a   : > { %p661_p4 = scmp.lt.u32.totalorder %s652_s19, %s909_s9 }
  0x3b   : > { %p656_p7 = pneg %p655_p5  ;;  %p660_p2 = por %p659_p1, %p658_p9 }
  0x3d   : > { %p662_p6 = por %p661_p4, %p660_p2 }
  0x3f   : > { %p663_p8 = pnand %p662_p6, %p656_p7 }
  0x41   : > { %666 = shalt.err (!%p663_p8)
}
  0x42   : > { %s667_s26 = scalar_lea.vmem %s911_s10, 128  ;;  %s773_s7 = smov [#allocation2]  }
  0x43   : > { %p668_p12 = scmp.ne.s32.totalorder %s911_s10, %s667_s26  ;;  %s672_s8 = sshll.u32 %s773_s7, 4  ;;  %s673_s8 = int_to_ptr.vmem [resolvable:$false] %s672_s8 }
  0x44   : > { %s674_s21 = scalar_lea.vmem %s673_s8, 256  ;;  %p675_p5 = scmp.lt.s32.totalorder %s911_s10, %s673_s8 }
  0x45   : > { %p670_p11 = pnand %p668_p12, %p654_p3  ;;  %p676_p9 = scmp.lt.s32.totalorder %s674_s21, %s667_s26 }
  0x47   : > { %p671_p0 = pneg %p670_p11  ;;  %p677_p1 = por %p676_p9, %p675_p5 }
  0x49   : > { %p678_p2 = pnand %p677_p1, %p671_p0 }
  0x4b   : > { %681 = shalt.err (!%p678_p2)
}
  0x4c   : > { %561 = dma.hbm_to_vmem [thread:$0]  (!%p915_p13), %s909_s9, 128, %s911_s10, %s179_s18  }
  0x4d   : > { %p1040_p7 = scmp.ne.s32.totalorder %s1034_s24, 0 }
  0x4e   : > { %s947_s19 = sand.u32 (!%p1040_p7), 1, %s752_s13   ;;  %p1041_p3 = scmp.ne.s32.totalorder (!%p1040_p7), %s1032_s22, 0 }
  0x4f   : > { %198 = sbr.rel (%p1040_p7) target bundleno = 387 (0x183), region = 32  ;;  %s462_s25 = sshll.u32 (!%p1040_p7), %s947_s19, 3 }
  0x50   : > { %s201_s27 = scalar_lea.sflag (!%p1040_p7), [#allocation3], %s947_s19  ;;  %s953_s4 = scalar_lea.vmem (!%p1040_p7), [#allocation2], %s462_s25 }
  0x56   : > { %735 = dma.done.wait (%p1041_p3), %s201_s27, 128  }
  0x57   : > { %737 = vsyncadd (%p1041_p3), %s201_s27, 4294967168  ;;  %p1042_p13 = scmp.ne.s32.totalorder %s1030_s20, 0 }
  0x59   : > { %739 = dma.done.wait (%p1042_p13), [#allocation6], 2048  }
  0x5a   : > { %741 = vsyncadd (%p1042_p13), [#allocation6], 4294965248  ;;  %v774_v0 = vmov 0.0|0.0   ;;  %vm775_vm0 = vmmov 0   ;;  %v776_v1 = vmov 0.0   ;;  %v239_v2 = vld [vmem:[#allocation5] sm:$0xff] }
  0x5b   : > { %522 = vmatprep.subr.bf16.mxu0 %v774_v0  ;;  %519 = vmatprep.mubr.msk.f32.mxu0 %vm775_vm0, %v776_v1  ;;  %v240_v3 = vld [vmem:[#allocation5 + $0x8] sm:$0xff]  ;;  %v241_v5 = vld [vmem:[#allocation5 + $0x10] sm:$0xff]  ;;  %v242_v6 = vld [vmem:[#allocation5 + $0x18] sm:$0xff]  ;;  %s467_s24 = sshll.u32 %s760_s15, 7  ;;  %s233_s9 = scalar_lea.vmem [#allocation7], %s462_s25 }
  0x5c   : > { %v523_v4 = vpack.c.bf16 %v240_v3, %v239_v2  ;;  %v526_v7 = vpack.c.bf16 %v242_v6, %v241_v5  ;;  %v243_v8 = vld [vmem:[#allocation5 + $0x20] sm:$0xff]  ;;  %v244_v9 = vld [vmem:[#allocation5 + $0x28] sm:$0xff]  ;;  %v245_v11 = vld [vmem:[#allocation5 + $0x30] sm:$0xff]  ;;  %s350_s10 = sshll.u32 %s233_s9, 4  ;;  %s973_s29 = scalar_lea.hbm %s1025_s3, %s467_s24  ;;  %s975_s10 = int_to_ptr.vmem [resolvable:$true] %s350_s10 }
  0x5d   : > { %v529_v10 = vpack.c.bf16 %v244_v9, %v243_v8  ;;  %v246_v12 = vld [vmem:[#allocation5 + $0x38] sm:$0xff]  ;;  %v247_v14 = vld [vmem:[#allocation5 + $0x40] sm:$0xff]  ;;  %v248_v15 = vld [vmem:[#allocation5 + $0x48] sm:$0xff]  ;;  %s336_s6 = scalar_lea.sflag [#allocation4], %s947_s19  ;;  %s682_s26 = scalar_lea.vmem %s975_s10, 128 }
  0x5e   : > { %524 = vmatpush3.bf16.xpose.msra.mxu0 %v523_v4  ;;  %v532_v13 = vpack.c.bf16 %v246_v12, %v245_v11  ;;  %v535_v16 = vpack.c.bf16 %v248_v15, %v247_v14  ;;  %v249_v17 = vld [vmem:[#allocation5 + $0x50] sm:$0xff]  ;;  %v250_v18 = vld [vmem:[#allocation5 + $0x58] sm:$0xff]  ;;  %v251_v20 = vld [vmem:[#allocation5 + $0x60] sm:$0xff]  ;;  %p683_p4 = scmp.ne.s32.totalorder %s975_s10, %s682_s26  ;;  %s777_s15 = smov [#allocation7]  }
  0x5f   : > { %525 = vmatprep.subr.bf16.mxu0 %v774_v0  ;;  %v538_v19 = vpack.c.bf16 %v250_v18, %v249_v17  ;;  %v252_v21 = vld [vmem:[#allocation5 + $0x68] sm:$0xff]  ;;  %v253_v23 = vld [vmem:[#allocation5 + $0x70] sm:$0xff]  ;;  %v254_v24 = vld [vmem:[#allocation5 + $0x78] sm:$0xff]  ;;  %s686_s7 = sshll.u32 %s777_s15, 4  ;;  %s687_s7 = int_to_ptr.vmem [resolvable:$false] %s686_s7 }
  0x60   : > { %v541_v22 = vpack.c.bf16 %v252_v21, %v251_v20  ;;  %v544_v25 = vpack.c.bf16 %v254_v24, %v253_v23  ;;  %v238_v26 = vld [vmem:[%s953_s4] sm:$0xff]  ;;  %p684_p6 = pnand %p683_p4, %p894_p10  ;;  %s688_s8 = scalar_lea.vmem %s687_s7, 256 }
  0x61   : > { %v465_v28 = vld [vmem:[%s1024_s2] ss:$0 sm:$0xff]  ;;  %p689_p12 = scmp.lt.s32.totalorder %s975_s10, %s687_s7  ;;  %p690_p11 = scmp.lt.s32.totalorder %s688_s8, %s682_s26 }
  0x62   : > { %p685_p8 = pneg %p684_p6 }
  0x63   : > { %p691_p0 = por %p690_p11, %p689_p12 }
  0x65   : > { %p692_p5 = pnand %p691_p0, %p685_p8 }
  0x66   : > { %527 = vmatpush3.bf16.xpose.msra.mxu0 %v526_v7 }
  0x67   : > { %528 = vmatprep.subr.bf16.mxu0 %v774_v0 }
  0x6e   : > { %530 = vmatpush3.bf16.xpose.msra.mxu0 %v529_v10 }
  0x6f   : > { %531 = vmatprep.subr.bf16.mxu0 %v774_v0 }
  0x76   : > { %533 = vmatpush3.bf16.xpose.msra.mxu0 %v532_v13 }
  0x77   : > { %534 = vmatprep.subr.bf16.mxu0 %v774_v0 }
  0x7e   : > { %536 = vmatpush3.bf16.xpose.msra.mxu0 %v535_v16 }
  0x7f   : > { %537 = vmatprep.subr.bf16.mxu0 %v774_v0 }
  0x86   : > { %539 = vmatpush3.bf16.xpose.msra.mxu0 %v538_v19 }
  0x87   : > { %540 = vmatprep.subr.bf16.mxu0 %v774_v0 }
  0x8e   : > { %542 = vmatpush3.bf16.xpose.msra.mxu0 %v541_v22 }
  0x8f   : > { %543 = vmatprep.subr.bf16.mxu0 %v774_v0 }
  0x96   : > { %545 = vmatpush3.bf16.xpose.msra.mxu0 %v544_v25 }
  0x9d   : > { %520 = vmatmul.mubr.f32.vlgmr.msra.gmra.mrb[0].mxu0 %v238_v26 }
 0x170   : > { %v321_v27 = vpop.f32.mrb[0].mxu0 }
 0x171   : > { %v325_v29 = vmul.f32 0.25, %v321_v27  ;;  %v521_v30 = vpop.f32.mrb[1].mxu0 }
 0x173   : > { %v333_v31 = vadd.f32 %v465_v28, %v325_v29 }
 0x175   : > { %334 = vst [vmem:[%s233_s9] sm:$0xff] %v333_v31 }
 0x176   : > { %695 = shalt.err (!%p692_p5)
}
 0x177   : > { %s696_s21 = scalar_lea.hbm %s973_s29, 128  ;;  %s700_s27 = scalar_lea.hbm %s1025_s3, 256 }
 0x178   : > { %p697_p9 = scmp.ne.s32.totalorder %s973_s29, %s696_s21  ;;  %p701_p7 = scmp.lt.u32.totalorder %s973_s29, %s1025_s3 }
 0x179   : > { %p702_p3 = scmp.lt.u32.totalorder %s700_s27, %s696_s21  ;;  %p704_p4 = scmp.lt.u32.totalorder %s696_s21, %s973_s29 }
 0x17a   : > { %p698_p1 = pnand %p697_p9, %p894_p10 }
 0x17b   : > { %p703_p13 = por %p702_p3, %p701_p7 }
 0x17c   : > { %p699_p2 = pneg %p698_p1 }
 0x17d   : > { %p705_p6 = por %p704_p4, %p703_p13 }
 0x17f   : > { %p706_p8 = pnand %p705_p6, %p699_p2 }
 0x181   : > { %709 = shalt.err (!%p706_p8)
}
 0x182   : > { %552 = dma.vmem_to_hbm [thread:$0]  (%p894_p10), %s975_s10, 128, %s973_s29, %s336_s6  }
 0x183 PF: > { %s362_s22 = sand.u32 1, %s748_s12   ;;  %p1043_p12 = scmp.ne.s32.totalorder %s1033_s23, 0 }
 0x184   : > { %p1044_p11 = scmp.ge.s32.totalorder %s768_s17, 2  ;;  %s363_s24 = scalar_lea.sflag [#allocation4], %s362_s22 }
 0x186   : > { %p563_p0 = pnand %p1044_p11, %p1043_p12 }
 0x188   : > { %743 = dma.done.wait (!%p563_p0), %s363_s24, 128  }
 0x189   : > { %745 = vsyncadd (!%p563_p0), %s363_s24, 4294967168  ;;  %s20_s17 = sadd.s32 1, %s768_s17   ;;  %s1045_s12 = smov %s752_s13 }
 0x18a   : > { %p17_p5 = scmp.ge.s32.totalorder %s20_s17, 4   ;;  %s1046_s13 = smov %s756_s14 }
 0x18b   : > { %s1047_s14 = smov %s903_s5  ;;  %s1048_s15 = smov %s764_s16 }
 0x18c   : > { %s1049_s16 = smov %s1051_s28  ;;  %19 = sbr.rel (!%p17_p5) target bundleno = 7 (0x7), region = 85 }
 0x193   :  { %368 = vsyncpa [#allocation3], 1 }
 0x194   :  { %370 = vsyncpa [#allocation3 + $0x1], 1 }
 0x195   :  { %371 = vsyncpa [#allocation6], 1 }
 0x196   :  { %372 = vsyncpa [#allocation4], 1 }
 0x197   :  { %374 = vsyncpa [#allocation4 + $0x1], 1 }

</bundles_post_ra>
